<compile_context>
chip_gen: v6e
topology: v6e:2x2x1
jax: 0.10.0
libtpu: 0.0.40
codegen_flags: <defaults>
</compile_context>

<pallas_src>
import functools
import math

import jax
import jax.numpy as jnp
from jax.experimental import pallas as pl
from jax.experimental.pallas import tpu as pltpu

LANE = 128


def _round_up(x, m):
    return (x + m - 1) // m * m


def _vmem_limit_bytes():
    """~75% of physical VMEM (48 MiB on v7x, 96 MiB on 128 MiB parts)."""
    try:
        cap = pltpu.get_tpu_info().vmem_capacity_bytes
    except Exception:
        cap = 128 * 1024 * 1024
    return int(cap) * 3 // 4


def _device_kind():
    try:
        return jax.devices()[0].device_kind.lower()
    except Exception:
        return ""


def _exp_in_bf16_default():
    # bf16 EUP exists on v6e / v7x; v5e and older must keep f32 exp.
    kind = _device_kind()
    return ("v6" in kind) or ("v7" in kind)


def _invariant_spec(shape):
    """Grid-invariant input: constant index_map + single buffering."""
    idx = lambda *_: (0,) * len(shape)
    try:
        return pl.BlockSpec(shape, idx, pipeline_mode=pl.Buffered(1))
    except Exception:  # older jax without pipeline_mode: plain double-buffered
        return pl.BlockSpec(shape, idx)


# --------------------------------------------------------------------------
# Kernel 1: projection  z = h @ W_all  and  eler = z_f32 @ blockdiag([Al|Ar])
# --------------------------------------------------------------------------
def _proj_kernel(h_ref, w_ref, a_ref, z_ref, eler_ref):
    z_f32 = jnp.dot(h_ref[...], w_ref[...],
                    preferred_element_type=jnp.float32)        # [tq, H*Dp] f32
    z_ref[...] = z_f32.astype(jnp.bfloat16)
    # column hh  = el_h (a_src . z)   column H+hh = er_h (a_dst . z)
    eler_ref[...] = jnp.dot(z_f32, a_ref[...],
                            preferred_element_type=jnp.float32)  # [tq, 128]


# --------------------------------------------------------------------------
# Kernel 2: masked-softmax attention + alpha @ z, tiled over query-row blocks
# --------------------------------------------------------------------------
def _attn_kernel(z_ref, el_ref, er_ref, adj_ref, o_ref, *,
                 num_heads, d_pad, exp_bf16):
    mask = adj_ref[...] != 0                                     # [tq, N] bool
    for hh in range(num_heads):
        lo = hh * d_pad
        z_h = z_ref[:, lo:lo + d_pad]                            # [N, Dp] bf16
        el_row = el_ref[hh:hh + 1, :]                            # [1, N]  f32
        er_col = er_ref[:, num_heads + hh:num_heads + hh + 1]    # [tq, 1] f32
        e = er_col + el_row                                      # [tq, N] f32
        e = jnp.maximum(e, 0.2 * e)                              # LeakyReLU(0.2)
        e = jnp.where(mask, e, -1e30)
        e = e - jnp.max(e, axis=-1, keepdims=True)
        if exp_bf16:                                             # v6e/v7x EUP
            p = jnp.exp(e.astype(jnp.bfloat16)).astype(jnp.float32)
        else:                                                    # v5e: f32 EUP
            p = jnp.exp(e)
        denom = jnp.maximum(jnp.sum(p, axis=-1, keepdims=True), 1e-30)
        alpha = (p * pl.reciprocal(denom, approx=True)).astype(jnp.bfloat16)
        o_ref[:, lo:lo + d_pad] = jnp.dot(
            alpha, z_h, preferred_element_type=jnp.float32).astype(jnp.bfloat16)


# --------------------------------------------------------------------------
# One GAT layer (all heads fused), wrapper around the two pallas_calls
# --------------------------------------------------------------------------
def gat_layer(h, adj_i8, w, a_l, a_r, *, apply_elu, exp_bf16,
              tq_target=256):
    n, f_in = h.shape
    num_heads, f_in_w, d_out = w.shape
    assert f_in_w == f_in
    assert 2 * num_heads <= LANE, "el/er packing assumes 2*heads <= 128"

    d_pad = _round_up(d_out, LANE)          # per-head lane-aligned slab
    f_pad = _round_up(f_in, LANE)
    hd_tot = num_heads * d_pad
    hp8 = _round_up(num_heads, 8)

    n_pad = _round_up(n, LANE)
    tq = min(tq_target, n_pad)
    n_pad = _round_up(n_pad, tq)            # pad N up instead of shrinking tq

    # --- repack operands into lane-dense, head-aligned layouts -------------
    h_p = jnp.zeros((n_pad, f_pad), jnp.bfloat16).at[:n, :f_in].set(
        h.astype(jnp.bfloat16))
    w_p = jnp.zeros((f_pad, hd_tot), jnp.bfloat16)
    a_mat = jnp.zeros((hd_tot, LANE), jnp.float32)
    for hh in range(num_heads):
        w_p = w_p.at[:f_in, hh * d_pad:hh * d_pad + d_out].set(
            w[hh].astype(jnp.bfloat16))
        a_mat = a_mat.at[hh * d_pad:hh * d_pad + d_out, hh].set(
            a_l[hh, 0].astype(jnp.float32))
        a_mat = a_mat.at[hh * d_pad:hh * d_pad + d_out, num_heads + hh].set(
            a_r[hh, 0].astype(jnp.float32))
    adj_p = jnp.zeros((n_pad, n_pad), jnp.int8).at[:n, :n].set(adj_i8)

    vmem_limit = _vmem_limit_bytes()
    grid = (n_pad // tq,)

    # --- 1) projection ------------------------------------------------------
    proj_flops = 2 * n_pad * f_pad * hd_tot + 2 * n_pad * hd_tot * LANE
    z_p, eler = pl.pallas_call(
        _proj_kernel,
        out_shape=(jax.ShapeDtypeStruct((n_pad, hd_tot), jnp.bfloat16),
                   jax.ShapeDtypeStruct((n_pad, LANE), jnp.float32)),
        grid=grid,
        in_specs=[
            pl.BlockSpec((tq, f_pad), lambda i: (i, 0)),         # h row block
            _invariant_spec((f_pad, hd_tot)),                    # W_all
            _invariant_spec((hd_tot, LANE)),                     # [Al|Ar]
        ],
        out_specs=(pl.BlockSpec((tq, hd_tot), lambda i: (i, 0)),
                   pl.BlockSpec((tq, LANE), lambda i: (i, 0))),
        compiler_params=pltpu.CompilerParams(
            dimension_semantics=("parallel",),
            vmem_limit_bytes=vmem_limit),
        cost_estimate=pl.CostEstimate(
            flops=proj_flops, transcendentals=0,
            bytes_accessed=(h_p.size * 2 + w_p.size * 2 + a_mat.size * 4
                            + n_pad * hd_tot * 2 + n_pad * LANE * 4)),
    )(h_p, w_p, a_mat)

    # el in row layout [heads(padded to 8), n_pad] (single small XLA transpose)
    el_rows = jnp.zeros((hp8, n_pad), jnp.float32).at[:num_heads, :].set(
        jnp.transpose(eler[:, :num_heads]))

    # --- 2) attention --------------------------------------------------------
    attn_flops = 2 * num_heads * n_pad * n_pad * d_pad
    kernel = functools.partial(_attn_kernel, num_heads=num_heads,
                               d_pad=d_pad, exp_bf16=exp_bf16)
    out_p = pl.pallas_call(
        kernel,
        out_shape=jax.ShapeDtypeStruct((n_pad, hd_tot), jnp.bfloat16),
        grid=grid,
        in_specs=[
            _invariant_spec((n_pad, hd_tot)),                    # z (all nodes)
            _invariant_spec((hp8, n_pad)),                       # el rows
            pl.BlockSpec((tq, LANE), lambda i: (i, 0)),          # el/er cols
            pl.BlockSpec((tq, n_pad), lambda i: (i, 0)),         # adj (int8)
        ],
        out_specs=pl.BlockSpec((tq, hd_tot), lambda i: (i, 0)),
        compiler_params=pltpu.CompilerParams(
            dimension_semantics=("parallel",),
            vmem_limit_bytes=vmem_limit),
        cost_estimate=pl.CostEstimate(
            flops=attn_flops,
            transcendentals=num_heads * n_pad * n_pad,
            bytes_accessed=(n_pad * hd_tot * 2 + hp8 * n_pad * 4
                            + n_pad * LANE * 4 + n_pad * n_pad
                            + n_pad * hd_tot * 2)),
    )(z_p, el_rows, eler, adj_p)

    # un-pad: first d_out lanes of each head slab, concat heads
    heads_out = [out_p[:n, hh * d_pad:hh * d_pad + d_out]
                 for hh in range(num_heads)]
    out = heads_out[0] if num_heads == 1 else jnp.concatenate(heads_out, -1)
    if apply_elu:
        out = jax.nn.elu(out)
    return out                                                    # bf16


# --------------------------------------------------------------------------
# GATNet.forward glue (supermask threshold + layer stack)
# --------------------------------------------------------------------------
def percentile_kthvalue(t_flat, q):
    """torch.kthvalue-style percentile (matches the PyTorch `percentile`)."""
    k = 1 + round(0.01 * float(q) * (t_flat.size - 1))
    return jnp.sort(t_flat)[k - 1]


def gat_net_forward(h, adj, params, scores, *, linear_sparsity,
                    enable_abs_comp=True):
    all_scores = jnp.concatenate([s.reshape(-1) for s in scores])
    if enable_abs_comp:
        threshold = percentile_kthvalue(jnp.abs(all_scores),
                                        linear_sparsity * 100.0)
    else:
        threshold = percentile_kthvalue(all_scores, linear_sparsity * 100.0)

    adj_i8 = (adj != 0).astype(jnp.int8)
    exp_bf16 = _exp_in_bf16_default()
    n_layers = len(params)
    out = h.astype(jnp.float32)
    for l, ((w, a_l, a_r), s) in enumerate(zip(params, scores)):
        # supermask: keep weights whose score magnitude exceeds the threshold
        w_masked = w * (jnp.abs(s) > threshold).astype(w.dtype)
        out = gat_layer(out, adj_i8, w_masked, a_l, a_r,
                        apply_elu=(l < n_layers - 1), exp_bf16=exp_bf16)
    return out.astype(jnp.float32)


if __name__ == "__main__":
    # args-equivalent config (n_layers=2 so layer dims compose as in __init__)
    N = 32
    num_feats = 16
    dim_hidden = 8
    num_classes = 4
    heads = 2
    linear_sparsity = 0.5

    key = jax.random.PRNGKey(0)
    keys = jax.random.split(key, 16)

    # deterministic small graph: ring + self-loops (dense adjacency mask)
    idx = jnp.arange(N)
    adj = jnp.zeros((N, N), jnp.int8)
    adj = adj.at[idx, idx].set(1)
    adj = adj.at[idx, (idx + 1) % N].set(1)
    adj = adj.at[idx, (idx - 1) % N].set(1)

    h = jax.random.normal(keys[0], (N, num_feats), jnp.float32)

    # layer 0: GATLayer(num_feats, dim_hidden, heads)
    # layer 1: GATLayer(dim_hidden * heads, num_classes, 1)
    layer_dims = [
        (num_feats, dim_hidden, heads),
        (dim_hidden * heads, num_classes, 1),
    ]

    params = []
    scores = []
    ki = 1
    for (f_in, d_out, hh) in layer_dims:
        w = jax.random.normal(keys[ki], (hh, f_in, d_out),
                              jnp.float32) / math.sqrt(f_in)
        ki += 1
        a_l = jax.random.normal(keys[ki], (hh, 1, d_out), jnp.float32) * 0.1
        ki += 1
        a_r = jax.random.normal(keys[ki], (hh, 1, d_out), jnp.float32) * 0.1
        ki += 1
        s = jax.random.normal(keys[ki], (hh, f_in, d_out), jnp.float32)
        ki += 1
        params.append((w, a_l, a_r))
        scores.append(s)

    out = gat_net_forward(h, adj, params, scores,
                          linear_sparsity=linear_sparsity)
    out = jax.block_until_ready(out)
    assert out.shape == (N, num_classes), out.shape
    assert bool(jnp.all(jnp.isfinite(out)))
    print("KERNEL_OK")
</pallas_src>

<mosaic_0001>
module attributes {stable_mosaic.version = 11 : i64} {
  func.func @_proj_kernel(%arg0: i32, %arg1: memref<128x128xbf16, #tpu.memory_space<vmem>>, %arg2: memref<128x256xbf16, #tpu.memory_space<vmem>>, %arg3: memref<256x128xf32, #tpu.memory_space<vmem>>, %arg4: memref<128x256xbf16, #tpu.memory_space<vmem>>, %arg5: memref<128x128xf32, #tpu.memory_space<vmem>>) attributes {dimension_semantics = [#tpu.dimension_semantics<parallel>], iteration_bounds = array<i64: 1>, scalar_prefetch = 0 : i64, scratch_operands = 0 : i64, tpu.core_type = #tpu.core_type<tc>, window_params = [{transform_indices = @transform_0, window_bounds = array<i64: 128, 128>}, {pipeline_mode = #tpu.pipeline_mode<synchronous>, transform_indices = @transform_1, window_bounds = array<i64: 128, 256>}, {pipeline_mode = #tpu.pipeline_mode<synchronous>, transform_indices = @transform_2, window_bounds = array<i64: 256, 128>}, {transform_indices = @transform_3, window_bounds = array<i64: 128, 256>}, {transform_indices = @transform_4, window_bounds = array<i64: 128, 128>}]} {
    %c0 = arith.constant 0 : index
    %c0_0 = arith.constant 0 : index
    %0 = vector.load %arg1[%c0, %c0_0] : memref<128x128xbf16, #tpu.memory_space<vmem>>, vector<128x128xbf16>
    %c0_1 = arith.constant 0 : index
    %c0_2 = arith.constant 0 : index
    %1 = vector.load %arg2[%c0_1, %c0_2] : memref<128x256xbf16, #tpu.memory_space<vmem>>, vector<128x256xbf16>
    %cst = arith.constant dense<0.000000e+00> : vector<128x256xf32>
    %2 = tpu.matmul %0, %1, %cst {dimension_numbers = #tpu.dot_dimension_numbers<[1], [0], [0], [1], [0, 0, 1, 1], [], []>} : vector<128x128xbf16>, vector<128x256xbf16>, vector<128x256xf32> -> vector<128x256xf32>
    %3 = arith.truncf %2 : vector<128x256xf32> to vector<128x256xbf16>
    %c0_3 = arith.constant 0 : index
    %c0_4 = arith.constant 0 : index
    %4 = vector.load %arg4[%c0_3, %c0_4] : memref<128x256xbf16, #tpu.memory_space<vmem>>, vector<128x256xbf16>
    tpu.vector_store %arg4[%c0_3, %c0_4], %3 {strides = array<i32>} : memref<128x256xbf16, #tpu.memory_space<vmem>>, vector<128x256xbf16>,
    %c0_5 = arith.constant 0 : index
    %c0_6 = arith.constant 0 : index
    %5 = vector.load %arg3[%c0_5, %c0_6] : memref<256x128xf32, #tpu.memory_space<vmem>>, vector<256x128xf32>
    %cst_7 = arith.constant dense<0.000000e+00> : vector<128x128xf32>
    %6 = tpu.matmul %2, %5, %cst_7 {dimension_numbers = #tpu.dot_dimension_numbers<[1], [0], [0], [1], [0, 0, 1, 1], [], []>} : vector<128x256xf32>, vector<256x128xf32>, vector<128x128xf32> -> vector<128x128xf32>
    %c0_8 = arith.constant 0 : index
    %c0_9 = arith.constant 0 : index
    %7 = vector.load %arg5[%c0_8, %c0_9] : memref<128x128xf32, #tpu.memory_space<vmem>>, vector<128x128xf32>
    tpu.vector_store %arg5[%c0_8, %c0_9], %6 {strides = array<i32>} : memref<128x128xf32, #tpu.memory_space<vmem>>, vector<128x128xf32>,
    return
  }
  func.func @transform_0(%arg0: i32) -> (i32, i32) {
    %c0_i32 = arith.constant 0 : i32
    %c0_i32_0 = arith.constant 0 : i32
    return %arg0, %c0_i32 : i32, i32
  }
  func.func @transform_1(%arg0: i32) -> (i32, i32) {
    %c0_i32 = arith.constant 0 : i32
    %c0_i32_0 = arith.constant 0 : i32
    %c0_i32_1 = arith.constant 0 : i32
    return %c0_i32, %c0_i32_0 : i32, i32
  }
  func.func @transform_2(%arg0: i32) -> (i32, i32) {
    %c0_i32 = arith.constant 0 : i32
    %c0_i32_0 = arith.constant 0 : i32
    %c0_i32_1 = arith.constant 0 : i32
    return %c0_i32, %c0_i32_0 : i32, i32
  }
  func.func @transform_3(%arg0: i32) -> (i32, i32) {
    %c0_i32 = arith.constant 0 : i32
    %c0_i32_0 = arith.constant 0 : i32
    return %arg0, %c0_i32 : i32, i32
  }
  func.func @transform_4(%arg0: i32) -> (i32, i32) {
    %c0_i32 = arith.constant 0 : i32
    %c0_i32_0 = arith.constant 0 : i32
    return %arg0, %c0_i32 : i32, i32
  }
}

</mosaic_0001>

<bundles_post_ra>
// kernel: tpu_custom_call.1
= control target key start
LH: loop header
LB: loop body
LE: loop exit
PB: predicated region body
PF: predicated region fallthrough
CT: control target
= control target key end

     0   :  { %10 = vsyncpa [#allocation3], 0  ;;  %s1028_s0 = inlined_call_operand.hbm [shape: bf16[128,128], index: 0, kind: input, shape index: {}]   ;;  %s1029_s1 = inlined_call_operand.hbm [shape: bf16[128,256], index: 1, kind: input, shape index: {}]   ;;  %s1030_s2 = inlined_call_operand.hbm [shape: f32[256,128], index: 2, kind: input, shape index: {}]   ;;  %s1031_s3 = inlined_call_operand.hbm [shape: bf16[128,256], index: 3, kind: output, shape index: {0}]   ;;  %s1032_s4 = inlined_call_operand.hbm [shape: f32[128,128], index: 4, kind: output, shape index: {1}]  }
   0x1   :  { %11 = vsyncpa [#allocation6], 0 }
   0x2   :  { %12 = vsyncpa [#allocation4], 0 }
   0x3   :  { %13 = vsyncpa [#allocation10], 0  ;;  %s958_s15 = smov [#allocation5]  }
   0x4   :  { %s31_s16 = sshll.u32 %s958_s15, 4  ;;  %s32_s16 = int_to_ptr.vmem [resolvable:$true] %s31_s16 }
   0x5   :  { %s858_s17 = scalar_lea.vmem %s32_s16, 2048  ;;  %p863_p1 = scmp.lt.s32.totalorder %s32_s16, %s32_s16 }
   0x6   :  { %p859_p0 = scmp.ne.s32.totalorder %s32_s16, %s858_s17  ;;  %p864_p2 = scmp.lt.s32.totalorder %s858_s17, %s858_s17 }
   0x8   :  { %p865_p3 = por %p864_p2, %p863_p1 }
   0xa   :  { %p866_p4 = pnand %p865_p3, %p859_p0 }
   0xc   :  { %869 = shalt.err (!%p866_p4)
}
   0xd   :  { %s959_s18 = smov 128   ;;  %s960_s19 = smov 8  }
   0xe   :  { %37 = dma.hbm_to_vmem [thread:$0]  %s1029_s1, 2048, %s32_s16, [#allocation6], %s959_s18, %s959_s18, %s960_s19  }
   0xf   :  { %s961_s22 = smov [#allocation2]  }
  0x10   :  { %s19_s23 = sshll.u32 %s961_s22, 4  ;;  %s20_s23 = int_to_ptr.vmem [resolvable:$true] %s19_s23 }
  0x11   :  { %s878_s24 = scalar_lea.vmem %s20_s23, 1024  ;;  %p883_p6 = scmp.lt.s32.totalorder %s20_s23, %s20_s23 }
  0x12   :  { %p879_p5 = scmp.ne.s32.totalorder %s20_s23, %s878_s24  ;;  %p884_p7 = scmp.lt.s32.totalorder %s878_s24, %s878_s24 }
  0x14   :  { %p885_p8 = por %p884_p7, %p883_p6 }
  0x16   :  { %p886_p9 = pnand %p885_p8, %p879_p5 }
  0x18   :  { %889 = shalt.err (!%p886_p9)
}
  0x19   :  { %s962_s25 = smov 64   ;;  %s963_s26 = smov 4  }
  0x1a   :  { %25 = dma.hbm_to_vmem [thread:$0]  %s1028_s0, 1024, %s20_s23, [#allocation3], %s962_s25, %s962_s25, %s963_s26  }
  0x1b   :  { %s964_s29 = smov [#allocation7]  }
  0x1c   :  { %s43_s30 = sshll.u32 %s964_s29, 4  ;;  %s44_s30 = int_to_ptr.vmem [resolvable:$true] %s43_s30 }
  0x1d   :  { %s898_s1 = scalar_lea.vmem %s44_s30, 4096  ;;  %p903_p11 = scmp.lt.s32.totalorder %s44_s30, %s44_s30 }
  0x1e   :  { %p899_p10 = scmp.ne.s32.totalorder %s44_s30, %s898_s1  ;;  %p904_p12 = scmp.lt.s32.totalorder %s898_s1, %s898_s1 }
  0x20   :  { %p905_p13 = por %p904_p12, %p903_p11 }
  0x22   :  { %p906_p0 = pnand %p905_p13, %p899_p10 }
  0x24   :  { %909 = shalt.err (!%p906_p0)
}
  0x25   :  { %49 = dma.hbm_to_vmem [thread:$0]  %s1030_s2, 4096, %s44_s30, [#allocation6], %s959_s18, %s959_s18, %s960_s19  }
  0x26   :  { %950 = dma.done.wait [#allocation3], 1024  }
  0x27   :  { %951 = vsyncadd [#allocation3], 4294966272 }
  0x28   :  { %952 = dma.done.wait [#allocation6], 6144  }
  0x29   :  { %953 = vsyncadd [#allocation6], 4294961152  ;;  %v965_v0 = vmov 0   ;;  %v818_v1 = vld [vmem:[#allocation5 + $0x74] ss:$8 sps:$4 sm:$0xff]   ;;  %v474_v18 = vld [vmem:[#allocation7 + $0xe8] sm:$0xff] }
  0x2a   :  { %252 = vmatprep.mubr.bf16.mxu0 %v965_v0  ;;  %v820_v2 = vld [vmem:[#allocation5 + $0x70] ss:$8 sps:$4 sm:$0xff]   ;;  %220 = vmatprep.subr.bf16.mxu0 %v818_v1  ;;  %v821_v3 = vld [vmem:[#allocation5 + $0x64] ss:$8 sps:$4 sm:$0xff]   ;;  %v823_v4 = vld [vmem:[#allocation5 + $0x60] ss:$8 sps:$4 sm:$0xff]  }
  0x2b   :  { %221 = vmatpush1.bf16.msra.mxu0 %v820_v2  ;;  %v824_v5 = vld [vmem:[#allocation5 + $0x54] ss:$8 sps:$4 sm:$0xff]   ;;  %v826_v6 = vld [vmem:[#allocation5 + $0x50] ss:$8 sps:$4 sm:$0xff]   ;;  %v827_v7 = vld [vmem:[#allocation5 + $0x44] ss:$8 sps:$4 sm:$0xff]  }
  0x2c   :  { %222 = vmatprep.subr.bf16.mxu0 %v821_v3  ;;  %v829_v8 = vld [vmem:[#allocation5 + $0x40] ss:$8 sps:$4 sm:$0xff]   ;;  %v830_v9 = vld [vmem:[#allocation5 + $0x34] ss:$8 sps:$4 sm:$0xff]   ;;  %v832_v10 = vld [vmem:[#allocation5 + $0x30] ss:$8 sps:$4 sm:$0xff]  }
  0x2d   :  { %v833_v11 = vld [vmem:[#allocation5 + $0x24] ss:$8 sps:$4 sm:$0xff]   ;;  %v835_v12 = vld [vmem:[#allocation5 + $0x20] ss:$8 sps:$4 sm:$0xff]   ;;  %v476_v13 = vld [vmem:[#allocation7 + $0xf8] sm:$0xff]  ;;  %s966_s0 = smov [#allocation8]  }
  0x2e   :  { %728 = vmatprep.subr.mxu1 %v476_v13  ;;  %v460_v14 = vld [vmem:[#allocation7 + $0x78] sm:$0xff]  ;;  %v475_v15 = vld [vmem:[#allocation7 + $0xf0] sm:$0xff]  ;;  %v458_v19 = vld [vmem:[#allocation7 + $0x68] sm:$0xff]  ;;  %s643_s2 = sshll.u32 %s966_s0, 4  ;;  %s644_s2 = int_to_ptr.vmem [resolvable:$true] %s643_s2 }
  0x2f   :  { %223 = vmatpush1.bf16.msra.mxu0 %v823_v4  ;;  %v459_v16 = vld [vmem:[#allocation7 + $0x70] sm:$0xff]  ;;  %729 = vmatpush3.msra.mxu1 %v460_v14  ;;  %v473_v20 = vld [vmem:[#allocation7 + $0xe0] sm:$0xff]  ;;  %v472_v24 = vld [vmem:[#allocation7 + $0xd8] sm:$0xff]  ;;  %s910_s7 = scalar_lea.vmem %s644_s2, 2048  ;;  %p915_p2 = scmp.lt.s32.totalorder %s644_s2, %s644_s2 }
  0x30   :  { %224 = vmatprep.subr.bf16.mxu0 %v824_v5  ;;  %v836_v17 = vld [vmem:[#allocation5 + $0x14] ss:$8 sps:$4 sm:$0xff]   ;;  %730 = vmatprep.subr.mxu1 %v475_v15  ;;  %v838_v21 = vld [vmem:[#allocation5 + $0x10] ss:$8 sps:$4 sm:$0xff]   ;;  %v457_v22 = vld [vmem:[#allocation7 + $0x60] sm:$0xff]  ;;  %p911_p1 = scmp.ne.s32.totalorder %s644_s2, %s910_s7  ;;  %p916_p3 = scmp.lt.s32.totalorder %s910_s7, %s910_s7 }
  0x31   :  { %731 = vmatpush3.msra.mxu1 %v459_v16  ;;  %v839_v23 = vld [vmem:[#allocation5 + $0x4] ss:$8 sps:$4 sm:$0xff]   ;;  %v456_v25 = vld [vmem:[#allocation7 + $0x58] sm:$0xff]  ;;  %v471_v26 = vld [vmem:[#allocation7 + $0xd0] sm:$0xff] }
  0x32   :  { %732 = vmatprep.subr.mxu1 %v474_v18  ;;  %v841_v27 = vld [vmem:[#allocation5] ss:$8 sps:$4 sm:$0xff]   ;;  %v455_v28 = vld [vmem:[#allocation7 + $0x50] sm:$0xff]  ;;  %v468_v34 = vld [vmem:[#allocation7 + $0xb8] sm:$0xff]  ;;  %p917_p4 = por %p916_p3, %p915_p2 }
  0x33   :  { %225 = vmatpush1.bf16.msra.mxu0 %v826_v6  ;;  %733 = vmatpush3.msra.mxu1 %v458_v19  ;;  %v470_v29 = vld [vmem:[#allocation7 + $0xc8] sm:$0xff]  ;;  %v842_v31 = vld [vmem:[#allocation2] sm:$0xff]   ;;  %v452_v35 = vld [vmem:[#allocation7 + $0x38] sm:$0xff] }
  0x34   :  { %226 = vmatprep.subr.bf16.mxu0 %v827_v7  ;;  %734 = vmatprep.subr.mxu1 %v473_v20  ;;  %v454_v30 = vld [vmem:[#allocation7 + $0x48] sm:$0xff]  ;;  %v469_v32 = vld [vmem:[#allocation7 + $0xc0] sm:$0xff]  ;;  %v467_v36 = vld [vmem:[#allocation7 + $0xb0] sm:$0xff]  ;;  %p918_p5 = pnand %p917_p4, %p911_p1 }
  0x35   :  { %735 = vmatpush3.msra.mxu1 %v457_v22  ;;  %v453_v33 = vld [vmem:[#allocation7 + $0x40] sm:$0xff]  ;;  %v451_v37 = vld [vmem:[#allocation7 + $0x30] sm:$0xff]  ;;  %v466_v38 = vld [vmem:[#allocation7 + $0xa8] sm:$0xff] }
  0x36   :  { %736 = vmatprep.subr.mxu1 %v472_v24  ;;  %v450_v39 = vld [vmem:[#allocation7 + $0x28] sm:$0xff]  ;;  %v465_v41 = vld [vmem:[#allocation7 + $0xa0] sm:$0xff]  ;;  %v464_v43 = vld [vmem:[#allocation7 + $0x98] sm:$0xff] }
  0x37   :  { %227 = vmatpush1.bf16.msra.mxu0 %v829_v8  ;;  %737 = vmatpush3.msra.mxu1 %v456_v25  ;;  %v843_v40 = vld [vmem:[#allocation2 + $0x8] sm:$0xff]   ;;  %v449_v42 = vld [vmem:[#allocation7 + $0x20] sm:$0xff]  ;;  %v448_v44 = vld [vmem:[#allocation7 + $0x18] sm:$0xff] }
  0x38   :  { %228 = vmatprep.subr.bf16.mxu0 %v830_v9  ;;  %738 = vmatprep.subr.mxu1 %v471_v26  ;;  %v463_v45 = vld [vmem:[#allocation7 + $0x90] sm:$0xff]  ;;  %v845_v48 = vld [vmem:[#allocation2 + $0x18] sm:$0xff]   ;;  %v846_v49 = vld [vmem:[#allocation2 + $0x20] sm:$0xff]  }
  0x39   :  { %739 = vmatpush3.msra.mxu1 %v455_v28  ;;  %v447_v46 = vld [vmem:[#allocation7 + $0x10] sm:$0xff]  ;;  %v847_v50 = vld [vmem:[#allocation2 + $0x28] sm:$0xff]   ;;  %v849_v52 = vld [vmem:[#allocation2 + $0x38] sm:$0xff]  }
  0x3a   :  { %740 = vmatprep.subr.mxu1 %v470_v29  ;;  %v844_v47 = vld [vmem:[#allocation2 + $0x10] sm:$0xff]   ;;  %v462_v53 = vld [vmem:[#allocation7 + $0x88] sm:$0xff]  ;;  %v461_v55 = vld [vmem:[#allocation7 + $0x80] sm:$0xff] }
  0x3b   :  { %229 = vmatpush1.bf16.msra.mxu0 %v832_v10  ;;  %741 = vmatpush3.msra.mxu1 %v454_v30  ;;  %v848_v51 = vld [vmem:[#allocation2 + $0x30] sm:$0xff]   ;;  %v446_v54 = vld [vmem:[#allocation7 + $0x8] sm:$0xff]  ;;  %v445_v56 = vld [vmem:[#allocation7] sm:$0xff] }
  0x3c   :  { %230 = vmatprep.subr.bf16.mxu0 %v833_v11  ;;  %742 = vmatprep.subr.mxu1 %v469_v32 }
  0x3d   :  { %743 = vmatpush3.msra.mxu1 %v453_v33 }
  0x3e   :  { %744 = vmatprep.subr.mxu1 %v468_v34 }
  0x3f   :  { %231 = vmatpush1.bf16.msra.mxu0 %v835_v12  ;;  %745 = vmatpush3.msra.mxu1 %v452_v35 }
  0x40   :  { %232 = vmatprep.subr.bf16.mxu0 %v836_v17  ;;  %746 = vmatprep.subr.mxu1 %v467_v36 }
  0x41   :  { %747 = vmatpush3.msra.mxu1 %v451_v37 }
  0x42   :  { %748 = vmatprep.subr.mxu1 %v466_v38 }
  0x43   :  { %233 = vmatpush1.bf16.msra.mxu0 %v838_v21  ;;  %749 = vmatpush3.msra.mxu1 %v450_v39 }
  0x44   :  { %234 = vmatprep.subr.bf16.mxu0 %v839_v23  ;;  %750 = vmatprep.subr.mxu1 %v465_v41 }
  0x45   :  { %751 = vmatpush3.msra.mxu1 %v449_v42 }
  0x46   :  { %752 = vmatprep.subr.mxu1 %v464_v43 }
  0x47   :  { %235 = vmatpush1.bf16.msra.mxu0 %v841_v27  ;;  %753 = vmatpush3.msra.mxu1 %v448_v44 }
  0x48   :  { %754 = vmatprep.subr.mxu1 %v463_v45 }
  0x49   :  { %755 = vmatpush3.msra.mxu1 %v447_v46 }
  0x4a   :  { %253 = vmatmul.mubr.bf16.vlgmr.msra.gmra.mxu0 %v842_v31  ;;  %756 = vmatprep.subr.mxu1 %v462_v53 }
  0x4b   :  { %262 = vmatprep.mubr.bf16.mxu0 %v965_v0  ;;  %757 = vmatpush3.msra.mxu1 %v446_v54 }
  0x4c   :  { %758 = vmatprep.subr.mxu1 %v461_v55 }
  0x4d   :  { %759 = vmatpush3.msra.mxu1 %v445_v56 }
  0x52   :  { %263 = vmatmul.mubr.bf16.gmra.mxu0 %v843_v40 }
  0x53   :  { %272 = vmatprep.mubr.bf16.mxu0 %v965_v0 }
  0x5a   :  { %273 = vmatmul.mubr.bf16.gmra.mxu0 %v844_v47 }
  0x5b   :  { %282 = vmatprep.mubr.bf16.mxu0 %v965_v0 }
  0x62   :  { %283 = vmatmul.mubr.bf16.gmra.mxu0 %v845_v48 }
  0x63   :  { %292 = vmatprep.mubr.bf16.mxu0 %v965_v0 }
  0x6a   :  { %293 = vmatmul.mubr.bf16.gmra.mxu0 %v846_v49 }
  0x6b   :  { %302 = vmatprep.mubr.bf16.mxu0 %v965_v0 }
  0x72   :  { %303 = vmatmul.mubr.bf16.gmra.mxu0 %v847_v50 }
  0x73   :  { %312 = vmatprep.mubr.bf16.mxu0 %v965_v0 }
  0x7a   :  { %313 = vmatmul.mubr.bf16.gmra.mxu0 %v848_v51 }
  0x7b   :  { %322 = vmatprep.mubr.bf16.mxu0 %v965_v0 }
  0x82   :  { %323 = vmatmul.mubr.bf16.gmra.mxu0 %v849_v52 }
 0x10a   :  { %v254_v57 = vpop.f32.mrf.mxu0 }
 0x10c   :  { %v256_v58 = vpop.f32.mrf.mxu0 }
 0x10d   :  { %v712_v59 = vpack.c.bf16 %v256_v58, %v254_v57  ;;  %541 = vmatprep.mubr.f32.mxu1 %v256_v58 }
 0x10e   :  { %v258_v60 = vpop.f32.mrf.mxu0  ;;  %542 = vmatmul.mubr.f32.vlgmr.msra.gmra.mxu1 %v254_v57 }
 0x10f   :  { %429 = vst [vmem:[#allocation8] sm:$0xff] %v712_v59 }
 0x110   :  { %v260_v61 = vpop.f32.mrf.mxu0 }
 0x111   :  { %v713_v62 = vpack.c.bf16 %v260_v61, %v258_v60  ;;  %546 = vmatprep.mubr.f32.mxu1 %v260_v61 }
 0x112   :  { %v264_v63 = vpop.f32.mrf.mxu0  ;;  %547 = vmatmul.mubr.f32.gmra.mxu1 %v258_v60 }
 0x113   :  { %430 = vst [vmem:[#allocation8 + $0x8] sm:$0xff] %v713_v62 }
 0x114   :  { %v266_v0 = vpop.f32.mrf.mxu0 }
 0x115   :  { %v714_v1 = vpack.c.bf16 %v266_v0, %v264_v63  ;;  %551 = vmatprep.mubr.f32.mxu1 %v266_v0 }
 0x116   :  { %v268_v2 = vpop.f32.mrf.mxu0  ;;  %552 = vmatmul.mubr.f32.gmra.mxu1 %v264_v63 }
 0x117   :  { %431 = vst [vmem:[#allocation8 + $0x10] sm:$0xff] %v714_v1 }
 0x118   :  { %v270_v3 = vpop.f32.mrf.mxu0 }
 0x119   :  { %v715_v4 = vpack.c.bf16 %v270_v3, %v268_v2  ;;  %556 = vmatprep.mubr.f32.mxu1 %v270_v3 }
 0x11a   :  { %v274_v5 = vpop.f32.mrf.mxu0  ;;  %557 = vmatmul.mubr.f32.gmra.mxu1 %v268_v2 }
 0x11b   :  { %432 = vst [vmem:[#allocation8 + $0x18] sm:$0xff] %v715_v4 }
 0x11c   :  { %v276_v6 = vpop.f32.mrf.mxu0 }
 0x11d   :  { %v716_v7 = vpack.c.bf16 %v276_v6, %v274_v5  ;;  %561 = vmatprep.mubr.f32.mxu1 %v276_v6 }
 0x11e   :  { %v278_v8 = vpop.f32.mrf.mxu0  ;;  %562 = vmatmul.mubr.f32.gmra.mxu1 %v274_v5 }
 0x11f   :  { %433 = vst [vmem:[#allocation8 + $0x20] sm:$0xff] %v716_v7 }
 0x120   :  { %v280_v9 = vpop.f32.mrf.mxu0 }
 0x121   :  { %v717_v10 = vpack.c.bf16 %v280_v9, %v278_v8  ;;  %566 = vmatprep.mubr.f32.mxu1 %v280_v9 }
 0x122   :  { %v284_v11 = vpop.f32.mrf.mxu0  ;;  %567 = vmatmul.mubr.f32.gmra.mxu1 %v278_v8 }
 0x123   :  { %434 = vst [vmem:[#allocation8 + $0x28] sm:$0xff] %v717_v10 }
 0x124   :  { %v286_v12 = vpop.f32.mrf.mxu0 }
 0x125   :  { %v718_v13 = vpack.c.bf16 %v286_v12, %v284_v11  ;;  %571 = vmatprep.mubr.f32.mxu1 %v286_v12 }
 0x126   :  { %v288_v14 = vpop.f32.mrf.mxu0  ;;  %572 = vmatmul.mubr.f32.gmra.mxu1 %v284_v11 }
 0x127   :  { %435 = vst [vmem:[#allocation8 + $0x30] sm:$0xff] %v718_v13 }
 0x128   :  { %v290_v15 = vpop.f32.mrf.mxu0 }
 0x129   :  { %v719_v16 = vpack.c.bf16 %v290_v15, %v288_v14  ;;  %576 = vmatprep.mubr.f32.mxu1 %v290_v15 }
 0x12a   :  { %v294_v17 = vpop.f32.mrf.mxu0  ;;  %577 = vmatmul.mubr.f32.gmra.mxu1 %v288_v14 }
 0x12b   :  { %436 = vst [vmem:[#allocation8 + $0x38] sm:$0xff] %v719_v16 }
 0x12c   :  { %v296_v18 = vpop.f32.mrf.mxu0 }
 0x12d   :  { %v720_v19 = vpack.c.bf16 %v296_v18, %v294_v17  ;;  %581 = vmatprep.mubr.f32.mxu1 %v296_v18 }
 0x12e   :  { %v298_v20 = vpop.f32.mrf.mxu0  ;;  %582 = vmatmul.mubr.f32.gmra.mxu1 %v294_v17 }
 0x12f   :  { %437 = vst [vmem:[#allocation8 + $0x40] sm:$0xff] %v720_v19 }
 0x130   :  { %v300_v21 = vpop.f32.mrf.mxu0 }
 0x131   :  { %v721_v22 = vpack.c.bf16 %v300_v21, %v298_v20  ;;  %586 = vmatprep.mubr.f32.mxu1 %v300_v21 }
 0x132   :  { %v304_v23 = vpop.f32.mrf.mxu0  ;;  %587 = vmatmul.mubr.f32.gmra.mxu1 %v298_v20 }
 0x133   :  { %438 = vst [vmem:[#allocation8 + $0x48] sm:$0xff] %v721_v22 }
 0x134   :  { %v306_v24 = vpop.f32.mrf.mxu0 }
 0x135   :  { %v722_v25 = vpack.c.bf16 %v306_v24, %v304_v23  ;;  %591 = vmatprep.mubr.f32.mxu1 %v306_v24 }
 0x136   :  { %v308_v26 = vpop.f32.mrf.mxu0  ;;  %592 = vmatmul.mubr.f32.gmra.mxu1 %v304_v23 }
 0x137   :  { %439 = vst [vmem:[#allocation8 + $0x50] sm:$0xff] %v722_v25 }
 0x138   :  { %v310_v27 = vpop.f32.mrf.mxu0 }
 0x139   :  { %v723_v28 = vpack.c.bf16 %v310_v27, %v308_v26  ;;  %596 = vmatprep.mubr.f32.mxu1 %v310_v27 }
 0x13a   :  { %v314_v29 = vpop.f32.mrf.mxu0  ;;  %597 = vmatmul.mubr.f32.gmra.mxu1 %v308_v26 }
 0x13b   :  { %440 = vst [vmem:[#allocation8 + $0x58] sm:$0xff] %v723_v28 }
 0x13c   :  { %v316_v30 = vpop.f32.mrf.mxu0 }
 0x13d   :  { %v724_v31 = vpack.c.bf16 %v316_v30, %v314_v29  ;;  %601 = vmatprep.mubr.f32.mxu1 %v316_v30 }
 0x13e   :  { %v318_v32 = vpop.f32.mrf.mxu0  ;;  %602 = vmatmul.mubr.f32.gmra.mxu1 %v314_v29 }
 0x13f   :  { %441 = vst [vmem:[#allocation8 + $0x60] sm:$0xff] %v724_v31 }
 0x140   :  { %v320_v33 = vpop.f32.mrf.mxu0 }
 0x141   :  { %v725_v34 = vpack.c.bf16 %v320_v33, %v318_v32  ;;  %606 = vmatprep.mubr.f32.mxu1 %v320_v33 }
 0x142   :  { %v324_v35 = vpop.f32.mrf.mxu0  ;;  %607 = vmatmul.mubr.f32.gmra.mxu1 %v318_v32 }
 0x143   :  { %442 = vst [vmem:[#allocation8 + $0x68] sm:$0xff] %v725_v34 }
 0x144   :  { %v326_v36 = vpop.f32.mrf.mxu0 }
 0x145   :  { %v726_v37 = vpack.c.bf16 %v326_v36, %v324_v35  ;;  %611 = vmatprep.mubr.f32.mxu1 %v326_v36 }
 0x146   :  { %v328_v38 = vpop.f32.mrf.mxu0  ;;  %612 = vmatmul.mubr.f32.gmra.mxu1 %v324_v35 }
 0x147   :  { %443 = vst [vmem:[#allocation8 + $0x70] sm:$0xff] %v726_v37 }
 0x148   :  { %v330_v39 = vpop.f32.mrf.mxu0 }
 0x149   :  { %v727_v40 = vpack.c.bf16 %v330_v39, %v328_v38  ;;  %616 = vmatprep.mubr.f32.mxu1 %v330_v39 }
 0x14a   :  { %617 = vmatmul.mubr.f32.gmra.mxu1 %v328_v38 }
 0x14b   :  { %444 = vst [vmem:[#allocation8 + $0x78] sm:$0xff] %v727_v40 }
 0x14c   :  { %921 = shalt.err (!%p918_p5)
}
 0x14d   :  { %649 = dma.vmem_to_hbm [thread:$0]  %s644_s2, 2048, %s1031_s3, [#allocation4], %s959_s18, %s959_s18, %s960_s19  }
 0x14e   :  { %s967_s3 = smov [#allocation9]  }
 0x14f   :  { %s655_s10 = sshll.u32 %s967_s3, 4  ;;  %s656_s10 = int_to_ptr.vmem [resolvable:$true] %s655_s10 }
 0x150   :  { %s930_s11 = scalar_lea.vmem %s656_s10, 2048  ;;  %p935_p7 = scmp.lt.s32.totalorder %s656_s10, %s656_s10 }
 0x151   :  { %p931_p6 = scmp.ne.s32.totalorder %s656_s10, %s930_s11  ;;  %p936_p8 = scmp.lt.s32.totalorder %s930_s11, %s930_s11 }
 0x153   :  { %p937_p9 = por %p936_p8, %p935_p7 }
 0x155   :  { %p938_p10 = pnand %p937_p9, %p931_p6 }
 0x1ce   :  { %v760_v41 = vpop.f32.mrf.mxu1 }
 0x1d0   :  { %v761_v42 = vpop.f32.mrf.mxu1 }
 0x1d1   :  { %v762_v43 = vadd.f32 %v761_v42, %v760_v41 }
 0x1d2   :  { %v763_v44 = vpop.f32.mrf.mxu1 }
 0x1d3   :  { %622 = vst [vmem:[#allocation9] sm:$0xff] %v762_v43 }
 0x1d4   :  { %v764_v45 = vpop.f32.mrf.mxu1 }
 0x1d5   :  { %v765_v46 = vadd.f32 %v764_v45, %v763_v44 }
 0x1d6   :  { %v766_v47 = vpop.f32.mrf.mxu1 }
 0x1d7   :  { %623 = vst [vmem:[#allocation9 + $0x8] sm:$0xff] %v765_v46 }
 0x1d8   :  { %v767_v48 = vpop.f32.mrf.mxu1 }
 0x1d9   :  { %v768_v49 = vadd.f32 %v767_v48, %v766_v47 }
 0x1da   :  { %v769_v50 = vpop.f32.mrf.mxu1 }
 0x1db   :  { %624 = vst [vmem:[#allocation9 + $0x10] sm:$0xff] %v768_v49 }
 0x1dc   :  { %v770_v51 = vpop.f32.mrf.mxu1 }
 0x1dd   :  { %v771_v52 = vadd.f32 %v770_v51, %v769_v50 }
 0x1de   :  { %v772_v53 = vpop.f32.mrf.mxu1 }
 0x1df   :  { %625 = vst [vmem:[#allocation9 + $0x18] sm:$0xff] %v771_v52 }
 0x1e0   :  { %v773_v54 = vpop.f32.mrf.mxu1 }
 0x1e1   :  { %v774_v55 = vadd.f32 %v773_v54, %v772_v53 }
 0x1e2   :  { %v775_v56 = vpop.f32.mrf.mxu1 }
 0x1e3   :  { %626 = vst [vmem:[#allocation9 + $0x20] sm:$0xff] %v774_v55 }
 0x1e4   :  { %v776_v57 = vpop.f32.mrf.mxu1 }
 0x1e5   :  { %v777_v58 = vadd.f32 %v776_v57, %v775_v56 }
 0x1e6   :  { %v778_v59 = vpop.f32.mrf.mxu1 }
 0x1e7   :  { %627 = vst [vmem:[#allocation9 + $0x28] sm:$0xff] %v777_v58 }
 0x1e8   :  { %v779_v60 = vpop.f32.mrf.mxu1 }
 0x1e9   :  { %v780_v61 = vadd.f32 %v779_v60, %v778_v59 }
 0x1ea   :  { %v781_v62 = vpop.f32.mrf.mxu1 }
 0x1eb   :  { %628 = vst [vmem:[#allocation9 + $0x30] sm:$0xff] %v780_v61 }
 0x1ec   :  { %v782_v63 = vpop.f32.mrf.mxu1 }
 0x1ed   :  { %v783_v0 = vadd.f32 %v782_v63, %v781_v62 }
 0x1ee   :  { %v784_v1 = vpop.f32.mrf.mxu1 }
 0x1ef   :  { %629 = vst [vmem:[#allocation9 + $0x38] sm:$0xff] %v783_v0 }
 0x1f0   :  { %v785_v2 = vpop.f32.mrf.mxu1 }
 0x1f1   :  { %v786_v3 = vadd.f32 %v785_v2, %v784_v1 }
 0x1f2   :  { %v787_v4 = vpop.f32.mrf.mxu1 }
 0x1f3   :  { %630 = vst [vmem:[#allocation9 + $0x40] sm:$0xff] %v786_v3 }
 0x1f4   :  { %v788_v5 = vpop.f32.mrf.mxu1 }
 0x1f5   :  { %v789_v6 = vadd.f32 %v788_v5, %v787_v4 }
 0x1f6   :  { %v790_v7 = vpop.f32.mrf.mxu1 }
 0x1f7   :  { %631 = vst [vmem:[#allocation9 + $0x48] sm:$0xff] %v789_v6 }
 0x1f8   :  { %v791_v8 = vpop.f32.mrf.mxu1 }
 0x1f9   :  { %v792_v9 = vadd.f32 %v791_v8, %v790_v7 }
 0x1fa   :  { %v793_v10 = vpop.f32.mrf.mxu1 }
 0x1fb   :  { %632 = vst [vmem:[#allocation9 + $0x50] sm:$0xff] %v792_v9 }
 0x1fc   :  { %v794_v11 = vpop.f32.mrf.mxu1 }
 0x1fd   :  { %v795_v12 = vadd.f32 %v794_v11, %v793_v10 }
 0x1fe   :  { %v796_v13 = vpop.f32.mrf.mxu1 }
 0x1ff   :  { %633 = vst [vmem:[#allocation9 + $0x58] sm:$0xff] %v795_v12 }
 0x200   :  { %v797_v14 = vpop.f32.mrf.mxu1 }
 0x201   :  { %v798_v15 = vadd.f32 %v797_v14, %v796_v13 }
 0x202   :  { %v799_v16 = vpop.f32.mrf.mxu1 }
 0x203   :  { %634 = vst [vmem:[#allocation9 + $0x60] sm:$0xff] %v798_v15 }
 0x204   :  { %v800_v17 = vpop.f32.mrf.mxu1 }
 0x205   :  { %v801_v18 = vadd.f32 %v800_v17, %v799_v16 }
 0x206   :  { %v802_v19 = vpop.f32.mrf.mxu1 }
 0x207   :  { %635 = vst [vmem:[#allocation9 + $0x68] sm:$0xff] %v801_v18 }
 0x208   :  { %v803_v20 = vpop.f32.mrf.mxu1 }
 0x209   :  { %v804_v21 = vadd.f32 %v803_v20, %v802_v19 }
 0x20a   :  { %v805_v22 = vpop.f32.mrf.mxu1 }
 0x20b   :  { %636 = vst [vmem:[#allocation9 + $0x70] sm:$0xff] %v804_v21 }
 0x20c   :  { %v806_v23 = vpop.f32.mrf.mxu1 }
 0x20d   :  { %v807_v24 = vadd.f32 %v806_v23, %v805_v22 }
 0x20f   :  { %637 = vst [vmem:[#allocation9 + $0x78] sm:$0xff] %v807_v24 }
 0x210   :  { %941 = shalt.err (!%p938_p10)
}
 0x211   :  { %661 = dma.vmem_to_hbm [thread:$0]  %s656_s10, 2048, %s1032_s4, [#allocation10], %s959_s18, %s959_s18, %s960_s19  }
 0x212   :  { %954 = dma.done.wait [#allocation4], 2048  }
 0x213   :  { %955 = vsyncadd [#allocation4], 4294965248 }
 0x214   :  { %956 = dma.done.wait [#allocation10], 2048  }
 0x215   :  { %957 = vsyncadd [#allocation10], 4294965248 }
 0x216   :  { %668 = vsyncpa [#allocation3], 1 }
 0x217   :  { %669 = vsyncpa [#allocation6], 1 }
 0x218   :  { %670 = vsyncpa [#allocation4], 1 }
 0x219   :  { %671 = vsyncpa [#allocation10], 1 }

</bundles_post_ra>
